<compile_context>
chip_gen: v7x
topology: tpu7x:2x2x1
jax: 0.10.0
libtpu: 0.0.40
codegen_flags: <defaults>
</compile_context>

<pallas_src>
import jax
import jax.numpy as jnp
from jax import lax
from jax.experimental import pallas as pl
from jax.experimental.pallas import tpu as pltpu


def _round_up(x, m):
    return ((x + m - 1) // m) * m


def mf_kernel(uid_ref, mid_ref, u_tab_ref, m_tab_ref, out_ref, gu_ref, gm_ref):
    # uid_ref, mid_ref : (1, TB)        int32 id tiles (batch on lanes)
    # u_tab_ref        : (Dp, CHUNK_N)  augmented user-table chunk
    # m_tab_ref        : (Dp, CHUNK_N)  augmented mission-table chunk
    # out_ref          : (1, TB)        f32 lane-dense output tile
    # gu_ref, gm_ref   : (Dp, TB)       f32 gather accumulators (persist over chunks)
    c = pl.program_id(1)
    n_chunks = pl.num_programs(1)
    chunk_n = u_tab_ref.shape[-1]
    TB = uid_ref.shape[-1]

    @pl.when(c == 0)
    def _():
        gu_ref[...] = jnp.zeros_like(gu_ref)
        gm_ref[...] = jnp.zeros_like(gm_ref)

    uid = uid_ref[...]                                            # (1, TB)
    mid = mid_ref[...]                                            # (1, TB)

    # One-hot selectors for THIS chunk only: row n is 1 where id == chunk_base + n.
    row = lax.broadcasted_iota(jnp.int32, (chunk_n, TB), 0) + c * chunk_n
    onehot_u = (row == uid).astype(u_tab_ref.dtype)               # (CHUNK_N, TB)
    onehot_m = (row == mid).astype(m_tab_ref.dtype)               # (CHUNK_N, TB)

    # MXU gather: (Dp, CHUNK_N) @ (CHUNK_N, TB) -> (Dp, TB); accumulate over chunks.
    gu_ref[...] += jnp.dot(u_tab_ref[...], onehot_u, preferred_element_type=jnp.float32)
    gm_ref[...] += jnp.dot(m_tab_ref[...], onehot_m, preferred_element_type=jnp.float32)

    @pl.when(c == n_chunks - 1)
    def _():
        # sum over Dp rows = <e_u, e_m> + user_bias + mission_bias (bias rows folded,
        # zero-padded rows contribute 0).  (1, TB) lane-dense store.
        out_ref[...] = jnp.sum(gu_ref[...] * gm_ref[...], axis=0, keepdims=True)


def mf_forward(user_ids, mission_ids, user_emb, mission_emb, user_bias, mission_bias,
               *, tile_b=1024, chunk_n=1024, compute_dtype=jnp.float32):
    """Pallas MF forward. Matches torch's `dot.squeeze()`: (B,) for B>1, scalar for B==1."""
    B = user_ids.shape[0]
    Nu, D = user_emb.shape
    Nm = mission_emb.shape[0]

    # ---- batch tiling (lane-dense, multiple of 128) ----
    TB = _round_up(min(tile_b, _round_up(B, 128)), 128)
    B_pad = _round_up(B, TB)
    n_tiles = B_pad // TB

    # ---- table tiling / padding ----
    Dp = _round_up(D + 2, 8)                         # sublane-aligned (emb + 2 bias rows)
    N_raw = max(Nu, Nm)
    CN = min(_round_up(chunk_n, 128), _round_up(N_raw, 128))   # chunk of table rows
    N_pad = _round_up(N_raw, CN)
    n_chunks = N_pad // CN

    # Pad ids with 0 (a valid row); padded predictions are discarded below.
    uid = jnp.pad(user_ids.astype(jnp.int32), (0, B_pad - B)).reshape(n_tiles, TB)
    mid = jnp.pad(mission_ids.astype(jnp.int32), (0, B_pad - B)).reshape(n_tiles, TB)

    # Augmented, transposed, zero-padded tables (built once on the host side).
    def build_table(emb, bias, bias_row_first):
        N = emb.shape[0]
        tab = jnp.zeros((Dp, N_pad), jnp.float32)
        tab = tab.at[:D, :N].set(emb.T.astype(jnp.float32))
        ones = jnp.ones((N,), jnp.float32)
        b = bias.reshape(-1).astype(jnp.float32)
        if bias_row_first:
            tab = tab.at[D, :N].set(b)       # u_bias * 1
            tab = tab.at[D + 1, :N].set(ones)
        else:
            tab = tab.at[D, :N].set(ones)    # 1 * m_bias
            tab = tab.at[D + 1, :N].set(b)
        return tab.astype(compute_dtype)

    u_tab = build_table(user_emb, user_bias, bias_row_first=True)      # (Dp, N_pad)
    m_tab = build_table(mission_emb, mission_bias, bias_row_first=False)

    isz = jnp.dtype(compute_dtype).itemsize
    cost = pl.CostEstimate(
        flops=int(4 * Dp * N_pad * B_pad + 2 * Dp * B_pad),
        transcendentals=0,
        bytes_accessed=int(2 * B_pad * 4                     # id tiles
                           + n_tiles * 2 * Dp * N_pad * isz  # table chunks per batch tile
                           + B_pad * 4),                     # output
    )

    # Explicit VMEM budget (review: re-derive instead of relying on the 32 MiB default).
    vmem_est = (2 * 2 * TB * 4                  # id tiles, double-buffered
                + 2 * 2 * Dp * CN * isz         # table chunks, double-buffered
                + 2 * TB * 4                    # output tile
                + 2 * Dp * TB * 4               # gu/gm accumulators
                + 2 * CN * TB * (isz + 4))      # one-hot + iota intermediates
    vmem_limit = int(min(max(2 * vmem_est, 32 << 20), 64 << 20))

    grid_spec = pltpu.PrefetchScalarGridSpec(
        num_scalar_prefetch=0,
        grid=(n_tiles, n_chunks),                            # reduction (chunk) axis last
        in_specs=[
            pl.BlockSpec((1, TB), lambda i, c: (i, 0)),      # user id tile
            pl.BlockSpec((1, TB), lambda i, c: (i, 0)),      # mission id tile
            pl.BlockSpec((Dp, CN), lambda i, c: (0, c)),     # user table chunk
            pl.BlockSpec((Dp, CN), lambda i, c: (0, c)),     # mission table chunk
        ],
        out_specs=pl.BlockSpec((1, TB), lambda i, c: (i, 0)),
        scratch_shapes=[pltpu.VMEM((Dp, TB), jnp.float32),
                        pltpu.VMEM((Dp, TB), jnp.float32)],
    )

    out = pl.pallas_call(
        mf_kernel,
        out_shape=jax.ShapeDtypeStruct((n_tiles, TB), jnp.float32),
        grid_spec=grid_spec,
        compiler_params=pltpu.CompilerParams(
            dimension_semantics=("parallel", "arbitrary"),
            vmem_limit_bytes=vmem_limit),
        cost_estimate=cost,
    )(uid, mid, u_tab, m_tab)

    preds = out.reshape(B_pad)[:B].reshape(B, 1)
    return jnp.squeeze(preds)   # same semantics as torch .squeeze()


def init_params(key, num_users, num_missions, embedding_dim):
    """Deterministic parameter init mirroring the PyTorch __init__."""
    k_u, k_m = jax.random.split(key, 2)

    def xavier_uniform(k, shape):
        fan_out, fan_in = shape  # nn.Embedding weight: (num_embeddings, dim)
        bound = jnp.sqrt(6.0 / (fan_in + fan_out))
        return jax.random.uniform(k, shape, jnp.float32, -bound, bound)

    user_emb = xavier_uniform(k_u, (num_users, embedding_dim))
    mission_emb = xavier_uniform(k_m, (num_missions, embedding_dim))
    user_bias = jnp.zeros((num_users, 1), jnp.float32)
    mission_bias = jnp.zeros((num_missions, 1), jnp.float32)
    return user_emb, mission_emb, user_bias, mission_bias


def _reference(user_ids, mission_ids, user_emb, mission_emb, user_bias, mission_bias):
    dot = (jnp.sum(user_emb[user_ids] * mission_emb[mission_ids], axis=1, keepdims=True)
           + user_bias[user_ids] + mission_bias[mission_ids])
    return jnp.squeeze(dot)


if __name__ == "__main__":
    num_users, num_missions, embedding_dim = 64, 48, 32

    key = jax.random.PRNGKey(0)
    k_params, k_u1, k_m1, k_u2, k_m2, k_big = jax.random.split(key, 6)

    user_emb, mission_emb, user_bias, mission_bias = init_params(
        k_params, num_users, num_missions, embedding_dim)
    # Make biases non-trivial so the bias path is actually checked.
    user_bias = user_bias + 0.1 * jnp.arange(num_users, dtype=jnp.float32)[:, None]
    mission_bias = mission_bias - 0.05 * jnp.arange(num_missions, dtype=jnp.float32)[:, None]

    # --- 1) small batch: single batch tile, single table chunk (resident tables) ---
    batch = 8
    user_ids = jax.random.randint(k_u1, (batch,), 0, num_users, dtype=jnp.int32)
    mission_ids = jax.random.randint(k_m1, (batch,), 0, num_missions, dtype=jnp.int32)

    out = jax.block_until_ready(
        mf_forward(user_ids, mission_ids, user_emb, mission_emb, user_bias, mission_bias))
    ref = _reference(user_ids, mission_ids, user_emb, mission_emb, user_bias, mission_bias)
    assert out.shape == (batch,)
    assert jnp.allclose(out, ref, atol=1e-5, rtol=1e-5), (out, ref)

    # --- 2) larger batch: padding + multiple batch tiles (parallel grid axis) ---
    batch2 = 300
    user_ids2 = jax.random.randint(k_u2, (batch2,), 0, num_users, dtype=jnp.int32)
    mission_ids2 = jax.random.randint(k_m2, (batch2,), 0, num_missions, dtype=jnp.int32)

    out2 = jax.block_until_ready(
        mf_forward(user_ids2, mission_ids2, user_emb, mission_emb, user_bias, mission_bias,
                   tile_b=128))                       # 3 tiles of 128 (padded to 384)
    ref2 = _reference(user_ids2, mission_ids2, user_emb, mission_emb, user_bias, mission_bias)
    assert out2.shape == (batch2,)
    assert jnp.allclose(out2, ref2, atol=1e-5, rtol=1e-5)

    # --- 3) bigger tables: exercise the chunked-gather accumulation path ---
    nu3, nm3, d3, batch3 = 300, 200, 16, 160
    kk = jax.random.split(k_big, 5)
    ue3 = jax.random.normal(kk[0], (nu3, d3), jnp.float32) * 0.1
    me3 = jax.random.normal(kk[1], (nm3, d3), jnp.float32) * 0.1
    ub3 = jax.random.normal(kk[2], (nu3, 1), jnp.float32) * 0.1
    mb3 = jax.random.normal(kk[3], (nm3, 1), jnp.float32) * 0.1
    uid3 = jax.random.randint(kk[4], (batch3,), 0, nu3, dtype=jnp.int32)
    mid3 = (uid3 * 7 + 3) % nm3

    out3 = jax.block_until_ready(
        mf_forward(uid3, mid3, ue3, me3, ub3, mb3, chunk_n=128))   # n_chunks = 3
    ref3 = _reference(uid3, mid3, ue3, me3, ub3, mb3)
    assert out3.shape == (batch3,)
    assert jnp.allclose(out3, ref3, atol=1e-5, rtol=1e-5)

    # --- 4) bf16 compute path (v6e/v7x MXU-friendly), loose tolerance ---
    out_bf = jax.block_until_ready(
        mf_forward(user_ids, mission_ids, user_emb, mission_emb, user_bias, mission_bias,
                   compute_dtype=jnp.bfloat16))
    assert jnp.allclose(out_bf, ref, atol=0.15, rtol=0.05)

    print("KERNEL_OK")
</pallas_src>

<mosaic_0001>
module attributes {stable_mosaic.version = 11 : i64} {
  func.func @mf_kernel(%arg0: i32, %arg1: i32, %arg2: memref<1x128xi32, #tpu.memory_space<vmem>>, %arg3: memref<1x128xi32, #tpu.memory_space<vmem>>, %arg4: memref<40x128xf32, #tpu.memory_space<vmem>>, %arg5: memref<40x128xf32, #tpu.memory_space<vmem>>, %arg6: memref<1x128xf32, #tpu.memory_space<vmem>>, %arg7: memref<40x128xf32, #tpu.memory_space<vmem>>, %arg8: memref<40x128xf32, #tpu.memory_space<vmem>>) attributes {dimension_semantics = [#tpu.dimension_semantics<parallel>, #tpu.dimension_semantics<arbitrary>], iteration_bounds = array<i64: 1, 1>, scalar_prefetch = 0 : i64, scratch_operands = 2 : i64, tpu.core_type = #tpu.core_type<tc>, window_params = [{transform_indices = @transform_0, window_bounds = array<i64: 1, 128>}, {transform_indices = @transform_1, window_bounds = array<i64: 1, 128>}, {transform_indices = @transform_2, window_bounds = array<i64: 40, 128>}, {transform_indices = @transform_3, window_bounds = array<i64: 40, 128>}, {transform_indices = @transform_4, window_bounds = array<i64: 1, 128>}]} {
    %c0_i32 = arith.constant 0 : i32
    %0 = arith.cmpi eq, %arg1, %c0_i32 : i32
    %1 = arith.extui %0 : i1 to i32
    %c0_i32_0 = arith.constant 0 : i32
    %2 = arith.cmpi ne, %1, %c0_i32_0 : i32
    scf.if %2 {
      %cst_19 = arith.constant 0.000000e+00 : f32
      %30 = vector.broadcast %cst_19 : f32 to vector<40x128xf32>
      %c0_20 = arith.constant 0 : index
      %c0_21 = arith.constant 0 : index
      %31 = vector.load %arg7[%c0_20, %c0_21] : memref<40x128xf32, #tpu.memory_space<vmem>>, vector<40x128xf32>
      tpu.vector_store %arg7[%c0_20, %c0_21], %30 {strides = array<i32>} : memref<40x128xf32, #tpu.memory_space<vmem>>, vector<40x128xf32>,
      %cst_22 = arith.constant 0.000000e+00 : f32
      %32 = vector.broadcast %cst_22 : f32 to vector<40x128xf32>
      %c0_23 = arith.constant 0 : index
      %c0_24 = arith.constant 0 : index
      %33 = vector.load %arg8[%c0_23, %c0_24] : memref<40x128xf32, #tpu.memory_space<vmem>>, vector<40x128xf32>
      tpu.vector_store %arg8[%c0_23, %c0_24], %32 {strides = array<i32>} : memref<40x128xf32, #tpu.memory_space<vmem>>, vector<40x128xf32>,
    } else {
    }
    %c0 = arith.constant 0 : index
    %c0_1 = arith.constant 0 : index
    %3 = vector.load %arg2[%c0, %c0_1] : memref<1x128xi32, #tpu.memory_space<vmem>>, vector<1x128xi32>
    %c0_2 = arith.constant 0 : index
    %c0_3 = arith.constant 0 : index
    %4 = vector.load %arg3[%c0_2, %c0_3] : memref<1x128xi32, #tpu.memory_space<vmem>>, vector<1x128xi32>
    %5 = tpu.iota {dimensions = array<i32: 0>} : vector<128x128xi32>
    %c128_i32 = arith.constant 128 : i32
    %6 = arith.muli %arg1, %c128_i32 : i32
    %7 = vector.broadcast %6 : i32 to vector<128x128xi32>
    %8 = arith.addi %5, %7 : vector<128x128xi32>
    %9 = vector.broadcast %3 : vector<1x128xi32> to vector<128x128xi32>
    %10 = arith.cmpi eq, %8, %9 : vector<128x128xi32>
    %11 = arith.extui %10 : vector<128x128xi1> to vector<128x128xi32>
    %12 = arith.sitofp %11 : vector<128x128xi32> to vector<128x128xf32>
    %13 = vector.broadcast %4 : vector<1x128xi32> to vector<128x128xi32>
    %14 = arith.cmpi eq, %8, %13 : vector<128x128xi32>
    %15 = arith.extui %14 : vector<128x128xi1> to vector<128x128xi32>
    %16 = arith.sitofp %15 : vector<128x128xi32> to vector<128x128xf32>
    %c0_4 = arith.constant 0 : index
    %c0_5 = arith.constant 0 : index
    %17 = vector.load %arg7[%c0_4, %c0_5] : memref<40x128xf32, #tpu.memory_space<vmem>>, vector<40x128xf32>
    %c0_6 = arith.constant 0 : index
    %c0_7 = arith.constant 0 : index
    %18 = vector.load %arg4[%c0_6, %c0_7] : memref<40x128xf32, #tpu.memory_space<vmem>>, vector<40x128xf32>
    %cst = arith.constant dense<0.000000e+00> : vector<40x128xf32>
    %19 = tpu.matmul %18, %12, %cst {dimension_numbers = #tpu.dot_dimension_numbers<[1], [0], [0], [1], [0, 0, 1, 1], [], []>} : vector<40x128xf32>, vector<128x128xf32>, vector<40x128xf32> -> vector<40x128xf32>
    %20 = arith.addf %17, %19 : vector<40x128xf32>
    %c0_8 = arith.constant 0 : index
    %c0_9 = arith.constant 0 : index
    %21 = vector.load %arg7[%c0_8, %c0_9] : memref<40x128xf32, #tpu.memory_space<vmem>>, vector<40x128xf32>
    tpu.vector_store %arg7[%c0_8, %c0_9], %20 {strides = array<i32>} : memref<40x128xf32, #tpu.memory_space<vmem>>, vector<40x128xf32>,
    %c0_10 = arith.constant 0 : index
    %c0_11 = arith.constant 0 : index
    %22 = vector.load %arg8[%c0_10, %c0_11] : memref<40x128xf32, #tpu.memory_space<vmem>>, vector<40x128xf32>
    %c0_12 = arith.constant 0 : index
    %c0_13 = arith.constant 0 : index
    %23 = vector.load %arg5[%c0_12, %c0_13] : memref<40x128xf32, #tpu.memory_space<vmem>>, vector<40x128xf32>
    %cst_14 = arith.constant dense<0.000000e+00> : vector<40x128xf32>
    %24 = tpu.matmul %23, %16, %cst_14 {dimension_numbers = #tpu.dot_dimension_numbers<[1], [0], [0], [1], [0, 0, 1, 1], [], []>} : vector<40x128xf32>, vector<128x128xf32>, vector<40x128xf32> -> vector<40x128xf32>
    %25 = arith.addf %22, %24 : vector<40x128xf32>
    %c0_15 = arith.constant 0 : index
    %c0_16 = arith.constant 0 : index
    %26 = vector.load %arg8[%c0_15, %c0_16] : memref<40x128xf32, #tpu.memory_space<vmem>>, vector<40x128xf32>
    tpu.vector_store %arg8[%c0_15, %c0_16], %25 {strides = array<i32>} : memref<40x128xf32, #tpu.memory_space<vmem>>, vector<40x128xf32>,
    %c0_i32_17 = arith.constant 0 : i32
    %27 = arith.cmpi eq, %arg1, %c0_i32_17 : i32
    %28 = arith.extui %27 : i1 to i32
    %c0_i32_18 = arith.constant 0 : i32
    %29 = arith.cmpi ne, %28, %c0_i32_18 : i32
    scf.if %29 {
      %c0_19 = arith.constant 0 : index
      %c0_20 = arith.constant 0 : index
      %30 = vector.load %arg7[%c0_19, %c0_20] : memref<40x128xf32, #tpu.memory_space<vmem>>, vector<40x128xf32>
      %c0_21 = arith.constant 0 : index
      %c0_22 = arith.constant 0 : index
      %31 = vector.load %arg8[%c0_21, %c0_22] : memref<40x128xf32, #tpu.memory_space<vmem>>, vector<40x128xf32>
      %32 = arith.mulf %30, %31 : vector<40x128xf32>
      %cst_23 = arith.constant dense<0.000000e+00> : vector<128xf32>
      %33 = vector.multi_reduction <add>, %32, %cst_23 [0] : vector<40x128xf32> to vector<128xf32>
      %34 = vector.shape_cast %33 : vector<128xf32> to vector<1x128xf32>
      %c0_24 = arith.constant 0 : index
      %c0_25 = arith.constant 0 : index
      %35 = vector.load %arg6[%c0_24, %c0_25] : memref<1x128xf32, #tpu.memory_space<vmem>>, vector<1x128xf32>
      tpu.vector_store %arg6[%c0_24, %c0_25], %34 {strides = array<i32>} : memref<1x128xf32, #tpu.memory_space<vmem>>, vector<1x128xf32>,
    } else {
    }
    return
  }
  func.func @transform_0(%arg0: i32, %arg1: i32) -> (i32, i32) {
    %c0_i32 = arith.constant 0 : i32
    %c0_i32_0 = arith.constant 0 : i32
    return %arg0, %c0_i32 : i32, i32
  }
  func.func @transform_1(%arg0: i32, %arg1: i32) -> (i32, i32) {
    %c0_i32 = arith.constant 0 : i32
    %c0_i32_0 = arith.constant 0 : i32
    return %arg0, %c0_i32 : i32, i32
  }
  func.func @transform_2(%arg0: i32, %arg1: i32) -> (i32, i32) {
    %c0_i32 = arith.constant 0 : i32
    %c0_i32_0 = arith.constant 0 : i32
    return %c0_i32, %arg1 : i32, i32
  }
  func.func @transform_3(%arg0: i32, %arg1: i32) -> (i32, i32) {
    %c0_i32 = arith.constant 0 : i32
    %c0_i32_0 = arith.constant 0 : i32
    return %c0_i32, %arg1 : i32, i32
  }
  func.func @transform_4(%arg0: i32, %arg1: i32) -> (i32, i32) {
    %c0_i32 = arith.constant 0 : i32
    %c0_i32_0 = arith.constant 0 : i32
    return %arg0, %c0_i32 : i32, i32
  }
}

</mosaic_0001>

<bundles_post_ra>
// kernel: tpu_custom_call.1
= control target key start
LH: loop header
LB: loop body
LE: loop exit
PB: predicated region body
PF: predicated region fallthrough
CT: control target
= control target key end

     0   :  { %9 = vsyncpa [#allocation5], 0  ;;  %s1030_s0 = inlined_call_operand.hbm [shape: s32[1,128], index: 0, kind: input, shape index: {}]   ;;  %s1031_s1 = inlined_call_operand.vmem [shape: s32[1,128], index: 1, kind: input, shape index: {}]   ;;  %s1032_s2 = inlined_call_operand.hbm [shape: f32[40,128], index: 2, kind: input, shape index: {}]   ;;  %s1033_s3 = inlined_call_operand.hbm [shape: f32[40,128], index: 3, kind: input, shape index: {}]   ;;  %s1034_s4 = inlined_call_operand.hbm [shape: f32[1,128], index: 4, kind: output, shape index: {}]  }
   0x1   :  { %10 = vsyncpa [#allocation8], 0 }
   0x2   :  { %11 = vsyncpa [#allocation6], 0  ;;  %s831_s15 = smov [#allocation7]   ;;  %s737_s19 = scalar_lea.hbm %s1032_s2, 640 }
   0x3   :  { %s29_s16 = sshll.u32 %s831_s15, 4  ;;  %p738_p0 = scmp.ne.s32.totalorder %s1032_s2, %s737_s19  ;;  %s30_s16 = int_to_ptr.vmem [resolvable:$true] %s29_s16 }
   0x4   :  { %p741_p1 = scmp.lt.u32.totalorder %s737_s19, %s1032_s2 }
   0x6   :  { %p743_p2 = pnand %p741_p1, %p738_p0 }
   0x8   :  { %746 = shalt.err (!%p743_p2)
}
   0x9   :  { %s747_s24 = scalar_lea.vmem %s30_s16, 640  ;;  %p752_p4 = scmp.lt.s32.totalorder %s30_s16, %s30_s16 }
   0xa   :  { %p748_p3 = scmp.ne.s32.totalorder %s30_s16, %s747_s24  ;;  %p753_p5 = scmp.lt.s32.totalorder %s747_s24, %s747_s24 }
   0xc   :  { %p754_p6 = por %p753_p5, %p752_p4 }
   0xe   :  { %p755_p7 = pnand %p754_p6, %p748_p3 }
  0x10   :  { %758 = shalt.err (!%p755_p7)
}
  0x11   :  { %s832_s25 = smov 128   ;;  %s833_s26 = smov 8  }
  0x12   :  { %35 = dma.hbm_to_vmem [thread:$0]  %s1032_s2, 640, %s30_s16, [#allocation8], %s832_s25, %s832_s25, %s833_s26  }
  0x13   :  { %s834_s29 = smov [#allocation4]   ;;  %s835_s5 = smov [#allocation9]  }
  0x14   :  { %s18_s30 = sshll.u32 %s834_s29, 4  ;;  %s41_s6 = sshll.u32 %s835_s5, 4  ;;  %s19_s30 = int_to_ptr.vmem [resolvable:$true] %s18_s30  ;;  %s42_s6 = int_to_ptr.vmem [resolvable:$true] %s41_s6 }
  0x15   :  { %s759_s9 = scalar_lea.hbm %s1030_s0, 16 }
  0x16   :  { %p760_p8 = scmp.ne.s32.totalorder %s1030_s0, %s759_s9  ;;  %p763_p9 = scmp.lt.u32.totalorder %s759_s9, %s1030_s0 }
  0x18   :  { %p765_p10 = pnand %p763_p9, %p760_p8 }
  0x1a   :  { %768 = shalt.err (!%p765_p10)
}
  0x1b   :  { %s769_s2 = scalar_lea.vmem %s19_s30, 16  ;;  %s773_s14 = scalar_lea.vmem %s19_s30, 32 }
  0x1c   :  { %p770_p11 = scmp.ne.s32.totalorder %s19_s30, %s769_s2  ;;  %p774_p12 = scmp.lt.s32.totalorder %s19_s30, %s19_s30 }
  0x1d   :  { %p775_p13 = scmp.lt.s32.totalorder %s773_s14, %s769_s2 }
  0x1f   :  { %p776_p0 = por %p775_p13, %p774_p12 }
  0x21   :  { %p777_p1 = pnand %p776_p0, %p770_p11 }
  0x23   :  { %780 = shalt.err (!%p777_p1)
}
  0x24   :  { %21 = dma.hbm_to_vmem [thread:$0]  %s1030_s0, 16, %s19_s30, [#allocation5]  }
  0x25   :  { %s781_s19 = scalar_lea.hbm %s1033_s3, 640 }
  0x26   :  { %p782_p2 = scmp.ne.s32.totalorder %s1033_s3, %s781_s19  ;;  %p785_p3 = scmp.lt.u32.totalorder %s781_s19, %s1033_s3 }
  0x28   :  { %p787_p4 = pnand %p785_p3, %p782_p2 }
  0x2a   :  { %790 = shalt.err (!%p787_p4)
}
  0x2b   :  { %s791_s24 = scalar_lea.vmem %s42_s6, 640  ;;  %p796_p6 = scmp.lt.s32.totalorder %s42_s6, %s42_s6 }
  0x2c   :  { %p792_p5 = scmp.ne.s32.totalorder %s42_s6, %s791_s24  ;;  %p797_p7 = scmp.lt.s32.totalorder %s791_s24, %s791_s24 }
  0x2e   :  { %p798_p8 = por %p797_p7, %p796_p6 }
  0x30   :  { %p799_p9 = pnand %p798_p8, %p792_p5 }
  0x32   :  { %802 = shalt.err (!%p799_p9)
}
  0x33   :  { %47 = dma.hbm_to_vmem [thread:$0]  %s1033_s3, 640, %s42_s6, [#allocation8], %s832_s25, %s832_s25, %s833_s26  }
  0x34   :  { %825 = dma.done.wait [#allocation5], 16  }
  0x35   :  { %826 = vsyncadd [#allocation5], 4294967280 }
  0x36   :  { %827 = dma.done.wait [#allocation8], 1280  }
  0x37   :  { %828 = vsyncadd [#allocation8], 4294966016  ;;  %v73_v0 = vlaneseq  ;;  %v836_v1 = vmov 0.0|0.0   ;;  %vm837_vm0 = vmmov 0   ;;  %v838_v3 = vmov 0.0   ;;  %v217_v22 = vld [vmem:[#allocation7] sm:$0xff] }
  0x38   :  { %679 = vmatprep.subr.bf16.mxu0 %v836_v1  ;;  %703 = vmatprep.subr.bf16.mxu1 %v836_v1  ;;  %v919_v7 = vld [vmem:[#allocation4] ss:$0 sm:$0xff]  ;;  %v839_v11 = vmov 1.0|1.0   ;;  %v327_v23 = vld [vmem:[#allocation9] sm:$0xff]  ;;  %v328_v25 = vld [vmem:[#allocation9 + $0x8] sm:$0xff] }
  0x39   :  { %v910_v2 = vshrl.u32 %v73_v0, 7  ;;  %617 = vmatprep.mubr.msk.f32.mxu0 %vm837_vm0, %v838_v3  ;;  %664 = vmatprep.mubr.msk.f32.mxu1 %vm837_vm0, %v838_v3  ;;  %v924_v8 = vld [vmem:[%s1031_s1] ss:$0 sm:$0xff]  ;;  %v218_v24 = vld [vmem:[#allocation7 + $0x8] sm:$0xff]  ;;  %v219_v26 = vld [vmem:[#allocation7 + $0x10] sm:$0xff]  ;;  %s840_s1 = smov [#allocation10]  }
  0x3a   :  { %v329_v27 = vld [vmem:[#allocation9 + $0x10] sm:$0xff]  ;;  %v330_v29 = vld [vmem:[#allocation9 + $0x18] sm:$0xff]  ;;  %v331_v31 = vld [vmem:[#allocation9 + $0x20] sm:$0xff]  ;;  %s467_s26 = sshll.u32 %s840_s1, 4  ;;  %s468_s26 = int_to_ptr.vmem [resolvable:$true] %s467_s26 }
  0x3b   :  { %v75_v4 = vadd.s32 8, %v910_v2  ;;  %v76_v5 = vadd.s32 16, %v910_v2  ;;  %v77_v6 = vadd.s32 24, %v910_v2  ;;  %v78_v9 = vadd.s32 32, %v910_v2  ;;  %v220_v28 = vld [vmem:[#allocation7 + $0x18] sm:$0xff]  ;;  %v221_v30 = vld [vmem:[#allocation7 + $0x20] sm:$0xff]  ;;  %p808_p11 = scmp.lt.s32.totalorder %s468_s26, %s468_s26 }
  0x3c   :  { %v79_v10 = vadd.s32 40, %v910_v2  ;;  %vm112_vm1 = vcmp.eq.s32.totalorder %v910_v2, %v919_v7  ;;  %vm164_vm3 = vcmp.eq.s32.totalorder %v910_v2, %v924_v8  ;;  %v80_v12 = vadd.s32 48, %v910_v2  ;;  %s803_s28 = scalar_lea.vmem %s468_s26, 16  ;;  %s807_s29 = scalar_lea.vmem %s468_s26, 32 }
  0x3d   :  { %vm113_vm2 = vcmp.eq.s32.totalorder %v75_v4, %v919_v7  ;;  %vm165_vm4 = vcmp.eq.s32.totalorder %v75_v4, %v924_v8  ;;  %vm114_vm6 = vcmp.eq.s32.totalorder %v76_v5, %v919_v7  ;;  %vm115_vm7 = vcmp.eq.s32.totalorder %v77_v6, %v919_v7  ;;  %p804_p10 = scmp.ne.s32.totalorder %s468_s26, %s803_s28  ;;  %p809_p12 = scmp.lt.s32.totalorder %s807_s29, %s803_s28 }
  0x3e   :  { %vm680_vm5 = vmpackc.low %vm113_vm2, %vm112_vm1  ;;  %vm166_vm8 = vcmp.eq.s32.totalorder %v76_v5, %v924_v8  ;;  %vm167_vm9 = vcmp.eq.s32.totalorder %v77_v6, %v924_v8  ;;  %vm116_vm13 = vcmp.eq.s32.totalorder %v78_v9, %v919_v7  ;;  %vm117_vm14 = vcmp.eq.s32.totalorder %v79_v10, %v919_v7 }
  0x3f   :  { %681 = vmatpush3.bf16.msk.msra.mxu0 %vm680_vm5, %v839_v11  ;;  %vm704_vm10 = vmpackc.low %vm165_vm4, %vm164_vm3  ;;  %v81_v13 = vadd.s32 56, %v910_v2  ;;  %vm168_vm15 = vcmp.eq.s32.totalorder %v78_v9, %v924_v8  ;;  %vm169_vm1 = vcmp.eq.s32.totalorder %v79_v10, %v924_v8  ;;  %vm118_vm4 = vcmp.eq.s32.totalorder %v80_v12, %v919_v7  ;;  %p810_p13 = por %p809_p12, %p808_p11 }
  0x40   :  { %705 = vmatpush3.bf16.msk.msra.mxu1 %vm704_vm10, %v839_v11  ;;  %682 = vmatprep.subr.bf16.mxu0 %v836_v1  ;;  %vm683_vm11 = vmpackc.low %vm115_vm7, %vm114_vm6  ;;  %v82_v14 = vadd.s32 64, %v910_v2  ;;  %v83_v15 = vadd.s32 72, %v910_v2  ;;  %vm170_vm6 = vcmp.eq.s32.totalorder %v80_v12, %v924_v8  ;;  %v84_v16 = vadd.s32 80, %v910_v2 }
  0x41   :  { %706 = vmatprep.subr.bf16.mxu1 %v836_v1  ;;  %vm707_vm12 = vmpackc.low %vm167_vm9, %vm166_vm8  ;;  %vm119_vm5 = vcmp.eq.s32.totalorder %v81_v13, %v919_v7  ;;  %vm171_vm7 = vcmp.eq.s32.totalorder %v81_v13, %v924_v8  ;;  %v85_v17 = vadd.s32 88, %v910_v2  ;;  %v86_v18 = vadd.s32 96, %v910_v2  ;;  %p811_p0 = pnand %p810_p13, %p804_p10 }
  0x42   :  { %vm686_vm2 = vmpackc.low %vm117_vm14, %vm116_vm13  ;;  %vm120_vm10 = vcmp.eq.s32.totalorder %v82_v14, %v919_v7  ;;  %vm173_vm13 = vcmp.eq.s32.totalorder %v83_v15, %v924_v8  ;;  %v87_v19 = vadd.s32 104, %v910_v2  ;;  %v88_v20 = vadd.s32 112, %v910_v2 }
  0x43   :  { %684 = vmatpush3.bf16.msk.msra.mxu0 %vm683_vm11, %v839_v11  ;;  %vm710_vm3 = vmpackc.low %vm169_vm1, %vm168_vm15  ;;  %vm121_vm11 = vcmp.eq.s32.totalorder %v83_v15, %v919_v7  ;;  %vm122_vm1 = vcmp.eq.s32.totalorder %v84_v16, %v919_v7  ;;  %v89_v21 = vadd.s32 120, %v910_v2 }
  0x44   :  { %708 = vmatpush3.bf16.msk.msra.mxu1 %vm707_vm12, %v839_v11  ;;  %685 = vmatprep.subr.bf16.mxu0 %v836_v1  ;;  %vm689_vm8 = vmpackc.low %vm119_vm5, %vm118_vm4  ;;  %vm172_vm12 = vcmp.eq.s32.totalorder %v82_v14, %v924_v8  ;;  %vm175_vm4 = vcmp.eq.s32.totalorder %v85_v17, %v924_v8 }
  0x45   :  { %709 = vmatprep.subr.bf16.mxu1 %v836_v1  ;;  %vm713_vm9 = vmpackc.low %vm171_vm7, %vm170_vm6  ;;  %vm124_vm7 = vcmp.eq.s32.totalorder %v86_v18, %v919_v7 }
  0x46   :  { %vm692_vm14 = vmpackc.low %vm121_vm11, %vm120_vm10  ;;  %vm177_vm10 = vcmp.eq.s32.totalorder %v87_v19, %v924_v8 }
  0x47   :  { %687 = vmatpush3.bf16.msk.msra.mxu0 %vm686_vm2, %v839_v11  ;;  %vm716_vm15 = vmpackc.low %vm173_vm13, %vm172_vm12  ;;  %vm123_vm2 = vcmp.eq.s32.totalorder %v85_v17, %v919_v7  ;;  %vm126_vm13 = vcmp.eq.s32.totalorder %v88_v20, %v919_v7 }
  0x48   :  { %711 = vmatpush3.bf16.msk.msra.mxu1 %vm710_vm3, %v839_v11  ;;  %688 = vmatprep.subr.bf16.mxu0 %v836_v1  ;;  %vm174_vm3 = vcmp.eq.s32.totalorder %v84_v16, %v924_v8  ;;  %vm695_vm5 = vmpackc.low %vm123_vm2, %vm122_vm1  ;;  %vm179_vm1 = vcmp.eq.s32.totalorder %v89_v21, %v924_v8 }
  0x49   :  { %712 = vmatprep.subr.bf16.mxu1 %v836_v1  ;;  %vm719_vm6 = vmpackc.low %vm175_vm4, %vm174_vm3 }
  0x4b   :  { %690 = vmatpush3.bf16.msk.msra.mxu0 %vm689_vm8, %v839_v11  ;;  %vm125_vm8 = vcmp.eq.s32.totalorder %v87_v19, %v919_v7 }
  0x4c   :  { %714 = vmatpush3.bf16.msk.msra.mxu1 %vm713_vm9, %v839_v11  ;;  %691 = vmatprep.subr.bf16.mxu0 %v836_v1  ;;  %vm176_vm9 = vcmp.eq.s32.totalorder %v86_v18, %v924_v8  ;;  %vm698_vm11 = vmpackc.low %vm125_vm8, %vm124_vm7 }
  0x4d   :  { %715 = vmatprep.subr.bf16.mxu1 %v836_v1  ;;  %vm722_vm12 = vmpackc.low %vm177_vm10, %vm176_vm9 }
  0x4f   :  { %693 = vmatpush3.bf16.msk.msra.mxu0 %vm692_vm14, %v839_v11  ;;  %vm127_vm14 = vcmp.eq.s32.totalorder %v89_v21, %v919_v7 }
  0x50   :  { %717 = vmatpush3.bf16.msk.msra.mxu1 %vm716_vm15, %v839_v11  ;;  %694 = vmatprep.subr.bf16.mxu0 %v836_v1  ;;  %vm178_vm15 = vcmp.eq.s32.totalorder %v88_v20, %v924_v8  ;;  %vm701_vm2 = vmpackc.low %vm127_vm14, %vm126_vm13 }
  0x51   :  { %718 = vmatprep.subr.bf16.mxu1 %v836_v1  ;;  %vm725_vm3 = vmpackc.low %vm179_vm1, %vm178_vm15 }
  0x53   :  { %696 = vmatpush3.bf16.msk.msra.mxu0 %vm695_vm5, %v839_v11 }
  0x54   :  { %720 = vmatpush3.bf16.msk.msra.mxu1 %vm719_vm6, %v839_v11  ;;  %697 = vmatprep.subr.bf16.mxu0 %v836_v1 }
  0x55   :  { %721 = vmatprep.subr.bf16.mxu1 %v836_v1 }
  0x57   :  { %699 = vmatpush3.bf16.msk.msra.mxu0 %vm698_vm11, %v839_v11 }
  0x58   :  { %723 = vmatpush3.bf16.msk.msra.mxu1 %vm722_vm12, %v839_v11  ;;  %700 = vmatprep.subr.bf16.mxu0 %v836_v1 }
  0x59   :  { %724 = vmatprep.subr.bf16.mxu1 %v836_v1 }
  0x5b   :  { %702 = vmatpush3.bf16.msk.msra.mxu0 %vm701_vm2, %v839_v11 }
  0x5c   :  { %726 = vmatpush3.bf16.msk.msra.mxu1 %vm725_vm3, %v839_v11 }
  0x5e   :  { %618 = vmatmul.mubr.f32.vlgmr.msra.gmra.mrb[0].mxu0 %v217_v22 }
  0x5f   :  { %665 = vmatmul.mubr.f32.vlgmr.msra.gmra.mrb[0].mxu1 %v327_v23  ;;  %620 = vmatprep.mubr.msk.f32.mxu0 %vm837_vm0, %v838_v3 }
  0x60   :  { %667 = vmatprep.mubr.msk.f32.mxu1 %vm837_vm0, %v838_v3 }
  0x62   :  { %621 = vmatmul.mubr.f32.gmra.mrb[2].mxu0 %v218_v24 }
  0x63   :  { %668 = vmatmul.mubr.f32.gmra.mrb[2].mxu1 %v328_v25  ;;  %623 = vmatprep.mubr.msk.f32.mxu0 %vm837_vm0, %v838_v3 }
  0x64   :  { %670 = vmatprep.mubr.msk.f32.mxu1 %vm837_vm0, %v838_v3 }
  0x66   :  { %624 = vmatmul.mubr.f32.gmra.mrb[4].mxu0 %v219_v26 }
  0x67   :  { %671 = vmatmul.mubr.f32.gmra.mrb[4].mxu1 %v329_v27  ;;  %626 = vmatprep.mubr.msk.f32.mxu0 %vm837_vm0, %v838_v3 }
  0x68   :  { %673 = vmatprep.mubr.msk.f32.mxu1 %vm837_vm0, %v838_v3 }
  0x6a   :  { %627 = vmatmul.mubr.f32.gmra.mrb[6].mxu0 %v220_v28 }
  0x6b   :  { %674 = vmatmul.mubr.f32.gmra.mrb[6].mxu1 %v330_v29  ;;  %629 = vmatprep.mubr.msk.f32.mxu0 %vm837_vm0, %v838_v3 }
  0x6c   :  { %676 = vmatprep.mubr.msk.f32.mxu1 %vm837_vm0, %v838_v3 }
  0x6e   :  { %630 = vmatmul.mubr.f32.gmra.mrb[8].mxu0 %v221_v30 }
  0x6f   :  { %677 = vmatmul.mubr.f32.gmra.mrb[8].mxu1 %v331_v31 }
 0x131   :  { %v288_v32 = vpop.f32.mrb[0].mxu0 }
 0x132   :  { %v398_v33 = vpop.f32.mrb[0].mxu1  ;;  %v619_v34 = vpop.f32.mrb[1].mxu0 }
 0x133   :  { %v445_v35 = vmul.f32 %v398_v33, %v288_v32  ;;  %v666_v36 = vpop.f32.mrb[1].mxu1 }
 0x135   :  { %v293_v37 = vpop.f32.mrb[2].mxu0 }
 0x136   :  { %v403_v38 = vpop.f32.mrb[2].mxu1  ;;  %v622_v39 = vpop.f32.mrb[3].mxu0 }
 0x137   :  { %v446_v40 = vmul.f32 %v403_v38, %v293_v37  ;;  %v669_v41 = vpop.f32.mrb[3].mxu1 }
 0x139   :  { %v450_v42 = vadd.f32 %v446_v40, %v445_v35  ;;  %v298_v43 = vpop.f32.mrb[4].mxu0 }
 0x13a   :  { %v408_v44 = vpop.f32.mrb[4].mxu1  ;;  %v625_v45 = vpop.f32.mrb[5].mxu0 }
 0x13b   :  { %v447_v46 = vmul.f32 %v408_v44, %v298_v43  ;;  %v672_v47 = vpop.f32.mrb[5].mxu1 }
 0x13d   :  { %v451_v48 = vadd.f32 %v450_v42, %v447_v46  ;;  %v303_v49 = vpop.f32.mrb[6].mxu0 }
 0x13e   :  { %v413_v50 = vpop.f32.mrb[6].mxu1  ;;  %v628_v51 = vpop.f32.mrb[7].mxu0 }
 0x13f   :  { %v448_v52 = vmul.f32 %v413_v50, %v303_v49  ;;  %v675_v53 = vpop.f32.mrb[7].mxu1 }
 0x141   :  { %v452_v54 = vadd.f32 %v451_v48, %v448_v52  ;;  %v308_v55 = vpop.f32.mrb[8].mxu0 }
 0x142   :  { %v418_v56 = vpop.f32.mrb[8].mxu1  ;;  %v631_v57 = vpop.f32.mrb[9].mxu0 }
 0x143   :  { %v449_v58 = vmul.f32 %v418_v56, %v308_v55  ;;  %v678_v59 = vpop.f32.mrb[9].mxu1 }
 0x145   :  { %v453_v60 = vadd.f32 %v452_v54, %v449_v58 }
 0x147   :  { %v454_v61 = vrot.slane %v453_v60, 4 }
 0x149   :  { %v455_v62 = vadd.f32 %v454_v61, %v453_v60 }
 0x14b   :  { %v456_v63 = vrot.slane %v455_v62, 2 }
 0x14d   :  { %v457_v0 = vadd.f32 %v456_v63, %v455_v62 }
 0x14f   :  { %v458_v1 = vrot.slane %v457_v0, 1 }
 0x151   :  { %v459_v2 = vadd.f32 %v458_v1, %v457_v0 }
 0x153   :  { %460 = vst [vmem:[#allocation10] sm:$0x1] %v459_v2 }
 0x154   :  { %814 = shalt.err (!%p811_p0)
}
 0x155   :  { %s815_s6 = scalar_lea.hbm %s1034_s4, 16 }
 0x156   :  { %p816_p1 = scmp.ne.s32.totalorder %s1034_s4, %s815_s6  ;;  %p819_p2 = scmp.lt.u32.totalorder %s815_s6, %s1034_s4 }
 0x158   :  { %p821_p3 = pnand %p819_p2, %p816_p1 }
 0x15a   :  { %824 = shalt.err (!%p821_p3)
}
 0x15b   :  { %470 = dma.vmem_to_hbm [thread:$0]  %s468_s26, 16, %s1034_s4, [#allocation6]  }
 0x15c   :  { %829 = dma.done.wait [#allocation6], 16  }
 0x15d   :  { %830 = vsyncadd [#allocation6], 4294967280 }
 0x15e   :  { %474 = vsyncpa [#allocation5], 1 }
 0x15f   :  { %475 = vsyncpa [#allocation8], 1 }
 0x160   :  { %476 = vsyncpa [#allocation6], 1 }

</bundles_post_ra>
